<compile_context>
chip_gen: v6e
topology: v6e:2x2x1
jax: 0.10.0
libtpu: 0.0.40
codegen_flags: <defaults>
</compile_context>

<pallas_src>
import functools

import jax
import jax.numpy as jnp
from jax.experimental import pallas as pl
from jax.experimental.pallas import tpu as pltpu

_LANE = 128
_NEG_LARGE = -1e30  # padded-class bias: exp(NEG_LARGE - m) underflows to 0 in f32


def _round_up(n, m):
    return ((n + m - 1) // m) * m


def _pad2(a, rows, cols, fill=0.0):
    r, c = a.shape
    if r == rows and c == cols:
        return a
    return jnp.pad(a, ((0, rows - r), (0, cols - c)), constant_values=fill)


def fcn_kernel(x_ref, w1_ref, b1_ref, w2_ref, b2_ref, w3_ref, b3_ref, out_ref):
    """Whole MLP + softmax on one padded batch tile.

    Matmul operands are bf16 (MXU native), accumulation and all elementwise work
    (bias, ReLU, softmax) stay in f32.  The x f32->bf16 cast happens here so the
    wrapper never writes a bf16 copy of the activations to HBM.
    """
    x = x_ref[...].astype(jnp.bfloat16)                              # (TB, IN_P)

    # fc1 + ReLU
    h = jnp.dot(x, w1_ref[...], preferred_element_type=jnp.float32) + b1_ref[...]
    h = jnp.maximum(h, 0.0)

    # fc2 + ReLU (PyTorch applies ReLU twice here; idempotent, so once suffices)
    h = jnp.dot(h.astype(jnp.bfloat16), w2_ref[...],
                preferred_element_type=jnp.float32) + b2_ref[...]
    h = jnp.maximum(h, 0.0)

    # fc3 (padded class columns carry bias = -1e30 -> they vanish in the softmax)
    logits = jnp.dot(h.astype(jnp.bfloat16), w3_ref[...],
                     preferred_element_type=jnp.float32) + b3_ref[...]

    # Numerically-stable softmax over the class (lane) dim, all in f32.
    # Exact divide so rows sum to 1 to f32 precision.
    m = jnp.max(logits, axis=-1, keepdims=True)
    e = jnp.exp(logits - m)
    denom = jnp.sum(e, axis=-1, keepdims=True)
    out_ref[...] = (e / denom).astype(out_ref.dtype)


def prepare_params(params):
    """One-time padding + bf16 cast of the weights (do NOT redo this per forward call).

    Returns (prepared_arrays, num_class).
    """
    w1, b1, w2, b2, w3, b3 = params
    in_size, hidden = w1.shape
    num_class = w3.shape[1]

    IN_P = _round_up(in_size, _LANE)
    H_P = _round_up(hidden, _LANE)      # 500 -> 512
    C_P = _round_up(num_class, _LANE)   # 10  -> 128

    # Zero padding is exact for the linear layers (padded hidden units produce exactly
    # 0 through ReLU and contribute nothing downstream); padded class columns get a
    # huge negative bias (kept in f32!) so softmax ignores them.
    w1_p = _pad2(w1, IN_P, H_P).astype(jnp.bfloat16)
    w2_p = _pad2(w2, H_P, H_P).astype(jnp.bfloat16)
    w3_p = _pad2(w3, H_P, C_P).astype(jnp.bfloat16)
    b1_p = _pad2(b1.reshape(1, -1), 1, H_P).astype(jnp.float32)
    b2_p = _pad2(b2.reshape(1, -1), 1, H_P).astype(jnp.float32)
    b3_p = jnp.pad(b3.reshape(1, -1), ((0, 0), (0, C_P - num_class)),
                   constant_values=_NEG_LARGE).astype(jnp.float32)

    prepared = (w1_p, b1_p, w2_p, b2_p, w3_p, b3_p)
    return prepared, num_class


def fcn_forward(x, prepared, *, num_class, tile_b=None, max_tile_b=512):
    """Fused FCN forward pass on pre-padded/pre-cast parameters.

    tile_b: batch tile.  If None it is chosen as round_up(B, 16) capped at max_tile_b
            (512 fills the 256-wide MXU on v6e/v7x twice; 16 is the bf16 sublane pack).
    """
    w1_p, b1_p, w2_p, b2_p, w3_p, b3_p = prepared
    B, in_size = x.shape
    IN_P, H_P = w1_p.shape
    C_P = w3_p.shape[1]

    if tile_b is None:
        tile_b = min(max_tile_b, _round_up(max(B, 16), 16))
    num_tiles = pl.cdiv(B, tile_b)
    B_P = num_tiles * tile_b

    # x stays f32 (cast to bf16 inside the kernel).  Padding is a no-op when B is
    # already tile-aligned and in_size is lane-aligned.
    x_p = _pad2(x.astype(jnp.float32), B_P, IN_P)

    # Rough VMEM estimate (double-buffered pipeline buffers + f32 intermediates).
    weight_bytes = (w1_p.size + w2_p.size + w3_p.size) * 2
    bias_bytes = (b1_p.size + b2_p.size + b3_p.size) * 4
    io_bytes = (tile_b * IN_P + tile_b * C_P) * 4
    est_bytes = 2 * (weight_bytes + bias_bytes + io_bytes) + 3 * tile_b * H_P * 4
    vmem_limit = None
    if est_bytes > 14 * (1 << 20):
        # Stay within v7x's 64 MiB physical VMEM per TensorCore (weights are
        # duplicated per core under the "parallel" batch axis).
        vmem_limit = int(min(est_bytes * 5 // 4, 48 * (1 << 20)))

    bcast = lambda shape: pl.BlockSpec(shape, lambda i: (0, 0))  # resident across grid

    out_p = pl.pallas_call(
        fcn_kernel,
        out_shape=jax.ShapeDtypeStruct((B_P, C_P), jnp.float32),
        grid_spec=pltpu.PrefetchScalarGridSpec(
            num_scalar_prefetch=0,
            grid=(num_tiles,),
            in_specs=[
                pl.BlockSpec((tile_b, IN_P), lambda i: (i, 0)),   # x: tiled over batch
                bcast((IN_P, H_P)), bcast((1, H_P)),              # fc1 weights/bias
                bcast((H_P, H_P)), bcast((1, H_P)),               # fc2 weights/bias
                bcast((H_P, C_P)), bcast((1, C_P)),               # fc3 weights/bias
            ],
            out_specs=pl.BlockSpec((tile_b, C_P), lambda i: (i, 0)),
        ),
        compiler_params=pltpu.CompilerParams(
            dimension_semantics=("parallel",),   # batch tiles independent -> megacore OK
            vmem_limit_bytes=vmem_limit,
        ),
    )(x_p, w1_p, b1_p, w2_p, b2_p, w3_p, b3_p)

    # Slice padded batch rows / padded class columns back off.
    return out_p[:B, :num_class]


def init_params(key, in_size, hidden, num_class):
    """Deterministic synthetic parameters (PyTorch Linear semantics, stored as (in, out))."""
    k1, k2, k3, k4, k5, k6 = jax.random.split(key, 6)
    scale = lambda fan_in: 1.0 / jnp.sqrt(jnp.float32(fan_in))
    w1 = jax.random.uniform(k1, (in_size, hidden), jnp.float32, -1.0, 1.0) * scale(in_size)
    b1 = jax.random.uniform(k2, (1, hidden), jnp.float32, -1.0, 1.0) * scale(in_size)
    w2 = jax.random.uniform(k3, (hidden, hidden), jnp.float32, -1.0, 1.0) * scale(hidden)
    b2 = jax.random.uniform(k4, (1, hidden), jnp.float32, -1.0, 1.0) * scale(hidden)
    w3 = jax.random.uniform(k5, (hidden, num_class), jnp.float32, -1.0, 1.0) * scale(hidden)
    b3 = jax.random.uniform(k6, (1, num_class), jnp.float32, -1.0, 1.0) * scale(hidden)
    return (w1, b1, w2, b2, w3, b3)


def fcn_reference(x, params, *, matmul_dtype=jnp.float32):
    """Plain-JAX reference. matmul_dtype=bf16 mirrors the kernel's MXU numerics."""
    w1, b1, w2, b2, w3, b3 = params
    dot = lambda a, b: jnp.dot(a.astype(matmul_dtype), b.astype(matmul_dtype),
                               preferred_element_type=jnp.float32)
    h = jnp.maximum(dot(x, w1) + b1, 0.0)
    h = jnp.maximum(dot(h, w2) + b2, 0.0)
    logits = dot(h, w3) + b3
    return jax.nn.softmax(logits, axis=-1)


if __name__ == "__main__":
    # Small shapes consistent with the module's forward (in_size defaults to 128).
    B, IN_SIZE, HIDDEN, NUM_CLASS = 8, 128, 500, 10

    key = jax.random.PRNGKey(0)
    kx, kp = jax.random.split(key)
    x = jax.random.normal(kx, (B, IN_SIZE), dtype=jnp.float32)
    params = init_params(kp, IN_SIZE, HIDDEN, NUM_CLASS)

    # One-time weight preparation (padding + bf16 cast cached outside the forward).
    prepared, num_class = prepare_params(params)

    fwd = jax.jit(functools.partial(fcn_forward, num_class=num_class))
    out = jax.block_until_ready(fwd(x, prepared))
    assert out.shape == (B, NUM_CLASS)

    ref_bf16 = jax.block_until_ready(fcn_reference(x, params, matmul_dtype=jnp.bfloat16))
    ref_f32 = jax.block_until_ready(fcn_reference(x, params, matmul_dtype=jnp.float32))

    # Tight check vs. a reference that matches the kernel's bf16-matmul / f32-accum numerics.
    assert jnp.allclose(out, ref_bf16, atol=2e-3, rtol=2e-3), "mismatch vs. bf16 reference"
    # Looser sanity check vs. the pure-f32 reference (bf16 input rounding dominates).
    assert jnp.allclose(out, ref_f32, atol=5e-2, rtol=5e-2), "mismatch vs. f32 reference"
    # Exact f32 divide in the kernel -> rows sum to 1 to f32 precision.
    assert jnp.allclose(jnp.sum(out, axis=-1), 1.0, atol=1e-4), "softmax rows must sum to ~1"

    print("KERNEL_OK")
</pallas_src>

<mosaic_0001>
module attributes {stable_mosaic.version = 11 : i64} {
  func.func @fcn_kernel(%arg0: i32, %arg1: memref<16x128xf32, #tpu.memory_space<vmem>>, %arg2: memref<128x512xbf16, #tpu.memory_space<vmem>>, %arg3: memref<1x512xf32, #tpu.memory_space<vmem>>, %arg4: memref<512x512xbf16, #tpu.memory_space<vmem>>, %arg5: memref<1x512xf32, #tpu.memory_space<vmem>>, %arg6: memref<512x128xbf16, #tpu.memory_space<vmem>>, %arg7: memref<1x128xf32, #tpu.memory_space<vmem>>, %arg8: memref<16x128xf32, #tpu.memory_space<vmem>>) attributes {dimension_semantics = [#tpu.dimension_semantics<parallel>], iteration_bounds = array<i64: 1>, scalar_prefetch = 0 : i64, scratch_operands = 0 : i64, tpu.core_type = #tpu.core_type<tc>, window_params = [{transform_indices = @transform_0, window_bounds = array<i64: 16, 128>}, {pipeline_mode = #tpu.pipeline_mode<synchronous>, transform_indices = @transform_1, window_bounds = array<i64: 128, 512>}, {pipeline_mode = #tpu.pipeline_mode<synchronous>, transform_indices = @transform_2, window_bounds = array<i64: 1, 512>}, {pipeline_mode = #tpu.pipeline_mode<synchronous>, transform_indices = @transform_3, window_bounds = array<i64: 512, 512>}, {pipeline_mode = #tpu.pipeline_mode<synchronous>, transform_indices = @transform_4, window_bounds = array<i64: 1, 512>}, {pipeline_mode = #tpu.pipeline_mode<synchronous>, transform_indices = @transform_5, window_bounds = array<i64: 512, 128>}, {pipeline_mode = #tpu.pipeline_mode<synchronous>, transform_indices = @transform_6, window_bounds = array<i64: 1, 128>}, {transform_indices = @transform_7, window_bounds = array<i64: 16, 128>}]} {
    %c0 = arith.constant 0 : index
    %c0_0 = arith.constant 0 : index
    %0 = vector.load %arg1[%c0, %c0_0] : memref<16x128xf32, #tpu.memory_space<vmem>>, vector<16x128xf32>
    %1 = arith.truncf %0 : vector<16x128xf32> to vector<16x128xbf16>
    %c0_1 = arith.constant 0 : index
    %c0_2 = arith.constant 0 : index
    %2 = vector.load %arg2[%c0_1, %c0_2] : memref<128x512xbf16, #tpu.memory_space<vmem>>, vector<128x512xbf16>
    %cst = arith.constant dense<0.000000e+00> : vector<16x512xf32>
    %3 = tpu.matmul %1, %2, %cst {dimension_numbers = #tpu.dot_dimension_numbers<[1], [0], [0], [1], [0, 0, 1, 1], [], []>} : vector<16x128xbf16>, vector<128x512xbf16>, vector<16x512xf32> -> vector<16x512xf32>
    %c0_3 = arith.constant 0 : index
    %c0_4 = arith.constant 0 : index
    %4 = vector.load %arg3[%c0_3, %c0_4] : memref<1x512xf32, #tpu.memory_space<vmem>>, vector<1x512xf32>
    %5 = vector.broadcast %4 : vector<1x512xf32> to vector<16x512xf32>
    %6 = arith.addf %3, %5 : vector<16x512xf32>
    %cst_5 = arith.constant 0.000000e+00 : f32
    %7 = vector.broadcast %cst_5 : f32 to vector<16x512xf32>
    %8 = arith.maximumf %6, %7 : vector<16x512xf32>
    %9 = arith.truncf %8 : vector<16x512xf32> to vector<16x512xbf16>
    %c0_6 = arith.constant 0 : index
    %c0_7 = arith.constant 0 : index
    %10 = vector.load %arg4[%c0_6, %c0_7] : memref<512x512xbf16, #tpu.memory_space<vmem>>, vector<512x512xbf16>
    %cst_8 = arith.constant dense<0.000000e+00> : vector<16x512xf32>
    %11 = tpu.matmul %9, %10, %cst_8 {dimension_numbers = #tpu.dot_dimension_numbers<[1], [0], [0], [1], [0, 0, 1, 1], [], []>} : vector<16x512xbf16>, vector<512x512xbf16>, vector<16x512xf32> -> vector<16x512xf32>
    %c0_9 = arith.constant 0 : index
    %c0_10 = arith.constant 0 : index
    %12 = vector.load %arg5[%c0_9, %c0_10] : memref<1x512xf32, #tpu.memory_space<vmem>>, vector<1x512xf32>
    %13 = vector.broadcast %12 : vector<1x512xf32> to vector<16x512xf32>
    %14 = arith.addf %11, %13 : vector<16x512xf32>
    %cst_11 = arith.constant 0.000000e+00 : f32
    %15 = vector.broadcast %cst_11 : f32 to vector<16x512xf32>
    %16 = arith.maximumf %14, %15 : vector<16x512xf32>
    %17 = arith.truncf %16 : vector<16x512xf32> to vector<16x512xbf16>
    %c0_12 = arith.constant 0 : index
    %c0_13 = arith.constant 0 : index
    %18 = vector.load %arg6[%c0_12, %c0_13] : memref<512x128xbf16, #tpu.memory_space<vmem>>, vector<512x128xbf16>
    %cst_14 = arith.constant dense<0.000000e+00> : vector<16x128xf32>
    %19 = tpu.matmul %17, %18, %cst_14 {dimension_numbers = #tpu.dot_dimension_numbers<[1], [0], [0], [1], [0, 0, 1, 1], [], []>} : vector<16x512xbf16>, vector<512x128xbf16>, vector<16x128xf32> -> vector<16x128xf32>
    %c0_15 = arith.constant 0 : index
    %c0_16 = arith.constant 0 : index
    %20 = vector.load %arg7[%c0_15, %c0_16] : memref<1x128xf32, #tpu.memory_space<vmem>>, vector<1x128xf32>
    %21 = vector.broadcast %20 : vector<1x128xf32> to vector<16x128xf32>
    %22 = arith.addf %19, %21 : vector<16x128xf32>
    %cst_17 = arith.constant dense<0xFF800000> : vector<16xf32>
    %23 = vector.multi_reduction <maximumf>, %22, %cst_17 [1] : vector<16x128xf32> to vector<16xf32>
    %24 = vector.shape_cast %23 : vector<16xf32> to vector<16x1xf32>
    %25 = vector.broadcast %24 : vector<16x1xf32> to vector<16x128xf32>
    %26 = arith.subf %22, %25 : vector<16x128xf32>
    %27 = math.exp %26 : vector<16x128xf32>
    %cst_18 = arith.constant dense<0.000000e+00> : vector<16xf32>
    %28 = vector.multi_reduction <add>, %27, %cst_18 [1] : vector<16x128xf32> to vector<16xf32>
    %29 = vector.shape_cast %28 : vector<16xf32> to vector<16x1xf32>
    %30 = vector.broadcast %29 : vector<16x1xf32> to vector<16x128xf32>
    %31 = arith.divf %27, %30 : vector<16x128xf32>
    %c0_19 = arith.constant 0 : index
    %c0_20 = arith.constant 0 : index
    %32 = vector.load %arg8[%c0_19, %c0_20] : memref<16x128xf32, #tpu.memory_space<vmem>>, vector<16x128xf32>
    tpu.vector_store %arg8[%c0_19, %c0_20], %31 {strides = array<i32>} : memref<16x128xf32, #tpu.memory_space<vmem>>, vector<16x128xf32>,
    return
  }
  func.func @transform_0(%arg0: i32) -> (i32, i32) {
    %c0_i32 = arith.constant 0 : i32
    %c0_i32_0 = arith.constant 0 : i32
    return %arg0, %c0_i32 : i32, i32
  }
  func.func @transform_1(%arg0: i32) -> (i32, i32) {
    %c0_i32 = arith.constant 0 : i32
    %c0_i32_0 = arith.constant 0 : i32
    %c0_i32_1 = arith.constant 0 : i32
    return %c0_i32, %c0_i32_0 : i32, i32
  }
  func.func @transform_2(%arg0: i32) -> (i32, i32) {
    %c0_i32 = arith.constant 0 : i32
    %c0_i32_0 = arith.constant 0 : i32
    %c0_i32_1 = arith.constant 0 : i32
    return %c0_i32, %c0_i32_0 : i32, i32
  }
  func.func @transform_3(%arg0: i32) -> (i32, i32) {
    %c0_i32 = arith.constant 0 : i32
    %c0_i32_0 = arith.constant 0 : i32
    %c0_i32_1 = arith.constant 0 : i32
    return %c0_i32, %c0_i32_0 : i32, i32
  }
  func.func @transform_4(%arg0: i32) -> (i32, i32) {
    %c0_i32 = arith.constant 0 : i32
    %c0_i32_0 = arith.constant 0 : i32
    %c0_i32_1 = arith.constant 0 : i32
    return %c0_i32, %c0_i32_0 : i32, i32
  }
  func.func @transform_5(%arg0: i32) -> (i32, i32) {
    %c0_i32 = arith.constant 0 : i32
    %c0_i32_0 = arith.constant 0 : i32
    %c0_i32_1 = arith.constant 0 : i32
    return %c0_i32, %c0_i32_0 : i32, i32
  }
  func.func @transform_6(%arg0: i32) -> (i32, i32) {
    %c0_i32 = arith.constant 0 : i32
    %c0_i32_0 = arith.constant 0 : i32
    %c0_i32_1 = arith.constant 0 : i32
    return %c0_i32, %c0_i32_0 : i32, i32
  }
  func.func @transform_7(%arg0: i32) -> (i32, i32) {
    %c0_i32 = arith.constant 0 : i32
    %c0_i32_0 = arith.constant 0 : i32
    return %arg0, %c0_i32 : i32, i32
  }
}

</mosaic_0001>

<bundles_post_ra>
// kernel: fcn_forward.1
= control target key start
LH: loop header
LB: loop body
LE: loop exit
PB: predicated region body
PF: predicated region fallthrough
CT: control target
= control target key end

     0   :  { %12 = vsyncpa [#allocation3], 0  ;;  %s2425_s0 = inlined_call_operand.vmem [shape: f32[16,128], index: 0, kind: input, shape index: {}]   ;;  %s2426_s1 = inlined_call_operand.hbm [shape: bf16[128,512], index: 1, kind: input, shape index: {}]   ;;  %s2427_s2 = inlined_call_operand.vmem [shape: f32[1,512], index: 2, kind: input, shape index: {}]   ;;  %s2428_s3 = inlined_call_operand.hbm [shape: bf16[512,512], index: 3, kind: input, shape index: {}]   ;;  %s2429_s4 = inlined_call_operand.vmem [shape: f32[1,512], index: 4, kind: input, shape index: {}]   ;;  %s2430_s5 = inlined_call_operand.hbm [shape: bf16[512,128], index: 5, kind: input, shape index: {}]   ;;  %s2431_s6 = inlined_call_operand.vmem [shape: f32[1,128], index: 6, kind: input, shape index: {}]   ;;  %s2432_s7 = inlined_call_operand.vmem [shape: f32[16,128], index: 7, kind: output, shape index: {}]  }
   0x1   :  { %13 = vsyncpa [#allocation5], 0  ;;  %s2317_s24 = smov [#allocation4]   ;;  %s2318_s26 = smov [#allocation2]  }
   0x2   :  { %s35_s25 = sshll.u32 %s2317_s24, 4  ;;  %s21_s27 = sshll.u32 %s2318_s26, 4  ;;  %s36_s25 = int_to_ptr.vmem [resolvable:$true] %s35_s25  ;;  %s22_s27 = int_to_ptr.vmem [resolvable:$true] %s21_s27 }
   0x3   :  { %s2261_s28 = scalar_lea.vmem %s36_s25, 16384  ;;  %p2266_p1 = scmp.lt.s32.totalorder %s36_s25, %s36_s25 }
   0x4   :  { %p2262_p0 = scmp.ne.s32.totalorder %s36_s25, %s2261_s28  ;;  %p2267_p2 = scmp.lt.s32.totalorder %s2261_s28, %s2261_s28 }
   0x6   :  { %p2268_p3 = por %p2267_p2, %p2266_p1 }
   0x8   :  { %p2269_p4 = pnand %p2268_p3, %p2262_p0 }
   0xa   :  { %2272 = shalt.err (!%p2269_p4)
}
   0xb   :  { %s2319_s29 = smov 256   ;;  %s2320_s30 = smov 16  }
   0xc   :  { %41 = dma.hbm_to_vmem [thread:$0]  %s2428_s3, 16384, %s36_s25, [#allocation5], %s2319_s29, %s2319_s29, %s2320_s30  }
   0xd   :  { %s2281_s10 = scalar_lea.vmem %s22_s27, 4096  ;;  %p2286_p6 = scmp.lt.s32.totalorder %s22_s27, %s22_s27 }
   0xe   :  { %p2282_p5 = scmp.ne.s32.totalorder %s22_s27, %s2281_s10  ;;  %p2287_p7 = scmp.lt.s32.totalorder %s2281_s10, %s2281_s10 }
  0x10   :  { %p2288_p8 = por %p2287_p7, %p2286_p6 }
  0x12   :  { %p2289_p9 = pnand %p2288_p8, %p2282_p5 }
  0x14   :  { %2292 = shalt.err (!%p2289_p9)
}
  0x15   :  { %27 = dma.hbm_to_vmem [thread:$0]  %s2426_s1, 4096, %s22_s27, [#allocation3], %s2319_s29, %s2319_s29, %s2320_s30  }
  0x16   :  { %s2321_s13 = smov [#allocation6]  }
  0x17   :  { %s49_s14 = sshll.u32 %s2321_s13, 4  ;;  %s50_s14 = int_to_ptr.vmem [resolvable:$true] %s49_s14 }
  0x18   :  { %s2301_s15 = scalar_lea.vmem %s50_s14, 4096  ;;  %p2306_p11 = scmp.lt.s32.totalorder %s50_s14, %s50_s14 }
  0x19   :  { %p2302_p10 = scmp.ne.s32.totalorder %s50_s14, %s2301_s15  ;;  %p2307_p12 = scmp.lt.s32.totalorder %s2301_s15, %s2301_s15 }
  0x1b   :  { %p2308_p13 = por %p2307_p12, %p2306_p11 }
  0x1d   :  { %p2309_p0 = pnand %p2308_p13, %p2302_p10 }
  0x1f   :  { %2312 = shalt.err (!%p2309_p0)
}
  0x20   :  { %s2322_s3 = smov 64   ;;  %s2323_s16 = smov 4  }
  0x21   :  { %55 = dma.hbm_to_vmem [thread:$0]  %s2430_s5, 4096, %s50_s14, [#allocation5], %s2322_s3, %s2322_s3, %s2323_s16  }
  0x22   :  { %2313 = dma.done.wait [#allocation3], 4096  }
  0x23   :  { %2314 = vsyncadd [#allocation3], 4294963200 }
  0x24   :  { %2315 = dma.done.wait [#allocation5], 20480  }
  0x25   :  { %2316 = vsyncadd [#allocation5], 4294946816  ;;  %v2324_v0 = vmov 0   ;;  %v1973_v1 = vld [vmem:[#allocation2 + $0xe4] ss:$16 sps:$4 sm:$0xff]   ;;  %v69_v34 = vld [vmem:[%s2425_s0 + $0x8] sm:$0xff] }
  0x26   :  { %317 = vmatprep.mubr.bf16.mxu0 %v2324_v0  ;;  %360 = vmatprep.mubr.bf16.mxu1 %v2324_v0  ;;  %v1975_v2 = vld [vmem:[#allocation2 + $0xec] ss:$16 sps:$4 sm:$0xff]   ;;  %v1977_v3 = vld [vmem:[#allocation2 + $0xe0] ss:$16 sps:$4 sm:$0xff]   ;;  %v1978_v4 = vld [vmem:[#allocation2 + $0xe8] ss:$16 sps:$4 sm:$0xff]  }
  0x27   :  { %285 = vmatprep.subr.bf16.mxu0 %v1973_v1  ;;  %328 = vmatprep.subr.bf16.mxu1 %v1975_v2  ;;  %v1979_v5 = vld [vmem:[#allocation2 + $0xc4] ss:$16 sps:$4 sm:$0xff]   ;;  %v1981_v6 = vld [vmem:[#allocation2 + $0xcc] ss:$16 sps:$4 sm:$0xff]   ;;  %v1983_v7 = vld [vmem:[#allocation2 + $0xc0] ss:$16 sps:$4 sm:$0xff]  }
  0x28   :  { %286 = vmatpush1.bf16.msra.mxu0 %v1977_v3  ;;  %329 = vmatpush1.bf16.msra.mxu1 %v1978_v4  ;;  %v1984_v8 = vld [vmem:[#allocation2 + $0xc8] ss:$16 sps:$4 sm:$0xff]   ;;  %v1985_v9 = vld [vmem:[#allocation2 + $0xa4] ss:$16 sps:$4 sm:$0xff]   ;;  %v1987_v10 = vld [vmem:[#allocation2 + $0xac] ss:$16 sps:$4 sm:$0xff]  }
  0x29   :  { %287 = vmatprep.subr.bf16.mxu0 %v1979_v5  ;;  %330 = vmatprep.subr.bf16.mxu1 %v1981_v6  ;;  %v1989_v11 = vld [vmem:[#allocation2 + $0xa0] ss:$16 sps:$4 sm:$0xff]   ;;  %v1990_v12 = vld [vmem:[#allocation2 + $0xa8] ss:$16 sps:$4 sm:$0xff]   ;;  %v1991_v13 = vld [vmem:[#allocation2 + $0x84] ss:$16 sps:$4 sm:$0xff]  }
  0x2a   :  { %v1993_v14 = vld [vmem:[#allocation2 + $0x8c] ss:$16 sps:$4 sm:$0xff]   ;;  %v1995_v15 = vld [vmem:[#allocation2 + $0x80] ss:$16 sps:$4 sm:$0xff]   ;;  %v1996_v16 = vld [vmem:[#allocation2 + $0x88] ss:$16 sps:$4 sm:$0xff]  }
  0x2b   :  { %v1997_v17 = vld [vmem:[#allocation2 + $0x64] ss:$16 sps:$4 sm:$0xff]   ;;  %v1999_v18 = vld [vmem:[#allocation2 + $0x6c] ss:$16 sps:$4 sm:$0xff]   ;;  %v2001_v19 = vld [vmem:[#allocation2 + $0x60] ss:$16 sps:$4 sm:$0xff]  }
  0x2c   :  { %288 = vmatpush1.bf16.msra.mxu0 %v1983_v7  ;;  %331 = vmatpush1.bf16.msra.mxu1 %v1984_v8  ;;  %v2002_v20 = vld [vmem:[#allocation2 + $0x68] ss:$16 sps:$4 sm:$0xff]   ;;  %v2003_v21 = vld [vmem:[#allocation2 + $0x44] ss:$16 sps:$4 sm:$0xff]   ;;  %v2005_v22 = vld [vmem:[#allocation2 + $0x4c] ss:$16 sps:$4 sm:$0xff]  }
  0x2d   :  { %289 = vmatprep.subr.bf16.mxu0 %v1985_v9  ;;  %332 = vmatprep.subr.bf16.mxu1 %v1987_v10  ;;  %v2007_v23 = vld [vmem:[#allocation2 + $0x40] ss:$16 sps:$4 sm:$0xff]   ;;  %v2008_v24 = vld [vmem:[#allocation2 + $0x48] ss:$16 sps:$4 sm:$0xff]   ;;  %v2009_v25 = vld [vmem:[#allocation2 + $0x24] ss:$16 sps:$4 sm:$0xff]  }
  0x2e   :  { %v2011_v26 = vld [vmem:[#allocation2 + $0x2c] ss:$16 sps:$4 sm:$0xff]   ;;  %v2013_v27 = vld [vmem:[#allocation2 + $0x20] ss:$16 sps:$4 sm:$0xff]   ;;  %v2014_v28 = vld [vmem:[#allocation2 + $0x28] ss:$16 sps:$4 sm:$0xff]  }
  0x2f   :  { %v2015_v29 = vld [vmem:[#allocation2 + $0x4] ss:$16 sps:$4 sm:$0xff]   ;;  %v2017_v30 = vld [vmem:[#allocation2 + $0xc] ss:$16 sps:$4 sm:$0xff]   ;;  %v2019_v31 = vld [vmem:[#allocation2] ss:$16 sps:$4 sm:$0xff]  }
  0x30   :  { %290 = vmatpush1.bf16.msra.mxu0 %v1989_v11  ;;  %333 = vmatpush1.bf16.msra.mxu1 %v1990_v12  ;;  %v2020_v32 = vld [vmem:[#allocation2 + $0x8] ss:$16 sps:$4 sm:$0xff]   ;;  %v68_v33 = vld [vmem:[%s2425_s0] sm:$0xff] }
  0x31   :  { %291 = vmatprep.subr.bf16.mxu0 %v1991_v13  ;;  %334 = vmatprep.subr.bf16.mxu1 %v1993_v14  ;;  %v2023_v35 = vld [vmem:[#allocation4 + $0xe4] ss:$16 sps:$4 sm:$0xff]   ;;  %v70_v37 = vpack.c.bf16 %v69_v34, %v68_v33  ;;  %v2021_v38 = vld [vmem:[#allocation4 + $0xe0] ss:$16 sps:$4 sm:$0xff]  }
  0x32   :  { %v2026_v36 = vld [vmem:[#allocation4 + $0x2e4] ss:$16 sps:$4 sm:$0xff]   ;;  %v2024_v39 = vld [vmem:[#allocation4 + $0x2e0] ss:$16 sps:$4 sm:$0xff]  }
  0x33   :  { %v2029_v40 = vld [vmem:[#allocation4 + $0xc4] ss:$16 sps:$4 sm:$0xff]   ;;  %v2027_v42 = vld [vmem:[#allocation4 + $0xc0] ss:$16 sps:$4 sm:$0xff]  }
  0x34   :  { %292 = vmatpush1.bf16.msra.mxu0 %v1995_v15  ;;  %335 = vmatpush1.bf16.msra.mxu1 %v1996_v16  ;;  %v2032_v41 = vld [vmem:[#allocation4 + $0x2c4] ss:$16 sps:$4 sm:$0xff]   ;;  %v2030_v43 = vld [vmem:[#allocation4 + $0x2c0] ss:$16 sps:$4 sm:$0xff]  }
  0x35   :  { %293 = vmatprep.subr.bf16.mxu0 %v1997_v17  ;;  %336 = vmatprep.subr.bf16.mxu1 %v1999_v18  ;;  %v2035_v44 = vld [vmem:[#allocation4 + $0xa4] ss:$16 sps:$4 sm:$0xff]   ;;  %v2033_v46 = vld [vmem:[#allocation4 + $0xa0] ss:$16 sps:$4 sm:$0xff]  }
  0x36   :  { %v2038_v45 = vld [vmem:[#allocation4 + $0x2a4] ss:$16 sps:$4 sm:$0xff]   ;;  %v2036_v47 = vld [vmem:[#allocation4 + $0x2a0] ss:$16 sps:$4 sm:$0xff]  }
  0x37   :  { %v2041_v48 = vld [vmem:[#allocation4 + $0x84] ss:$16 sps:$4 sm:$0xff]   ;;  %v2039_v50 = vld [vmem:[#allocation4 + $0x80] ss:$16 sps:$4 sm:$0xff]  }
  0x38   :  { %294 = vmatpush1.bf16.msra.mxu0 %v2001_v19  ;;  %337 = vmatpush1.bf16.msra.mxu1 %v2002_v20  ;;  %v2044_v49 = vld [vmem:[#allocation4 + $0x284] ss:$16 sps:$4 sm:$0xff]   ;;  %v2042_v51 = vld [vmem:[#allocation4 + $0x280] ss:$16 sps:$4 sm:$0xff]  }
  0x39   :  { %295 = vmatprep.subr.bf16.mxu0 %v2003_v21  ;;  %338 = vmatprep.subr.bf16.mxu1 %v2005_v22  ;;  %v2047_v52 = vld [vmem:[#allocation4 + $0x64] ss:$16 sps:$4 sm:$0xff]   ;;  %v2045_v54 = vld [vmem:[#allocation4 + $0x60] ss:$16 sps:$4 sm:$0xff]  }
  0x3a   :  { %v2050_v53 = vld [vmem:[#allocation4 + $0x264] ss:$16 sps:$4 sm:$0xff]   ;;  %v2048_v55 = vld [vmem:[#allocation4 + $0x260] ss:$16 sps:$4 sm:$0xff]  }
  0x3b   :  { %v2053_v56 = vld [vmem:[#allocation4 + $0x44] ss:$16 sps:$4 sm:$0xff]   ;;  %v2051_v58 = vld [vmem:[#allocation4 + $0x40] ss:$16 sps:$4 sm:$0xff]  }
  0x3c   :  { %296 = vmatpush1.bf16.msra.mxu0 %v2007_v23  ;;  %339 = vmatpush1.bf16.msra.mxu1 %v2008_v24  ;;  %v2056_v57 = vld [vmem:[#allocation4 + $0x244] ss:$16 sps:$4 sm:$0xff]   ;;  %v2054_v59 = vld [vmem:[#allocation4 + $0x240] ss:$16 sps:$4 sm:$0xff]  }
  0x3d   :  { %297 = vmatprep.subr.bf16.mxu0 %v2009_v25  ;;  %340 = vmatprep.subr.bf16.mxu1 %v2011_v26  ;;  %v2059_v60 = vld [vmem:[#allocation4 + $0x24] ss:$16 sps:$4 sm:$0xff]   ;;  %v2057_v62 = vld [vmem:[#allocation4 + $0x20] ss:$16 sps:$4 sm:$0xff]  }
  0x3e   :  { %v2062_v61 = vld [vmem:[#allocation4 + $0x224] ss:$16 sps:$4 sm:$0xff]   ;;  %v2060_v63 = vld [vmem:[#allocation4 + $0x220] ss:$16 sps:$4 sm:$0xff]  }
  0x3f   :  { %v2065_v0 = vld [vmem:[#allocation4 + $0x4] ss:$16 sps:$4 sm:$0xff]   ;;  %v2063_v2 = vld [vmem:[#allocation4] ss:$16 sps:$4 sm:$0xff]  }
  0x40   :  { %298 = vmatpush1.bf16.msra.mxu0 %v2013_v27  ;;  %341 = vmatpush1.bf16.msra.mxu1 %v2014_v28  ;;  %v2068_v1 = vld [vmem:[#allocation4 + $0x204] ss:$16 sps:$4 sm:$0xff]   ;;  %v2066_v3 = vld [vmem:[#allocation4 + $0x200] ss:$16 sps:$4 sm:$0xff]  }
  0x41   :  { %299 = vmatprep.subr.bf16.mxu0 %v2015_v29  ;;  %342 = vmatprep.subr.bf16.mxu1 %v2017_v30  ;;  %v2071_v4 = vld [vmem:[#allocation4 + $0x1e4] ss:$16 sps:$4 sm:$0xff]   ;;  %v2069_v6 = vld [vmem:[#allocation4 + $0x1e0] ss:$16 sps:$4 sm:$0xff]  }
  0x42   :  { %v2074_v5 = vld [vmem:[#allocation4 + $0x3e4] ss:$16 sps:$4 sm:$0xff]   ;;  %v2072_v7 = vld [vmem:[#allocation4 + $0x3e0] ss:$16 sps:$4 sm:$0xff]  }
  0x43   :  { %v2077_v8 = vld [vmem:[#allocation4 + $0x1c4] ss:$16 sps:$4 sm:$0xff]   ;;  %v2075_v10 = vld [vmem:[#allocation4 + $0x1c0] ss:$16 sps:$4 sm:$0xff]  }
  0x44   :  { %300 = vmatpush1.bf16.msra.mxu0 %v2019_v31  ;;  %343 = vmatpush1.bf16.msra.mxu1 %v2020_v32  ;;  %v2080_v9 = vld [vmem:[#allocation4 + $0x3c4] ss:$16 sps:$4 sm:$0xff]   ;;  %v2078_v11 = vld [vmem:[#allocation4 + $0x3c0] ss:$16 sps:$4 sm:$0xff]  }
  0x45   :  { %1173 = vmatprep.subr.bf16.mxu0 %v2023_v35  ;;  %1216 = vmatprep.subr.bf16.mxu1 %v2026_v36  ;;  %v2083_v12 = vld [vmem:[#allocation4 + $0x1a4] ss:$16 sps:$4 sm:$0xff]   ;;  %v2081_v14 = vld [vmem:[#allocation4 + $0x1a0] ss:$16 sps:$4 sm:$0xff]   ;;  %v2119_v36 = vld [vmem:[#allocation4 + $0xec] ss:$16 sps:$4 sm:$0xff]  }
  0x46   :  { %v2086_v13 = vld [vmem:[#allocation4 + $0x3a4] ss:$16 sps:$4 sm:$0xff]   ;;  %v2084_v15 = vld [vmem:[#allocation4 + $0x3a0] ss:$16 sps:$4 sm:$0xff]  }
  0x47   :  { %318 = vmatmul.mubr.bf16.vlgmr.msra.gmra.mxu0 %v70_v37  ;;  %361 = vmatmul.mubr.bf16.vlgmr.msra.gmra.mxu1 %v70_v37  ;;  %v2089_v16 = vld [vmem:[#allocation4 + $0x184] ss:$16 sps:$4 sm:$0xff]   ;;  %v2087_v18 = vld [vmem:[#allocation4 + $0x180] ss:$16 sps:$4 sm:$0xff]   ;;  %v2122_v37 = vld [vmem:[#allocation4 + $0x2ec] ss:$16 sps:$4 sm:$0xff]  }
  0x48   :  { %1174 = vmatpush1.bf16.msra.mxu0 %v2021_v38  ;;  %1217 = vmatpush1.bf16.msra.mxu1 %v2024_v39  ;;  %v2092_v17 = vld [vmem:[#allocation4 + $0x384] ss:$16 sps:$4 sm:$0xff]   ;;  %v2090_v19 = vld [vmem:[#allocation4 + $0x380] ss:$16 sps:$4 sm:$0xff]   ;;  %v105_v38 = vlaneseq }
  0x49   :  { %1175 = vmatprep.subr.bf16.mxu0 %v2029_v40  ;;  %1218 = vmatprep.subr.bf16.mxu1 %v2032_v41  ;;  %v2095_v20 = vld [vmem:[#allocation4 + $0x164] ss:$16 sps:$4 sm:$0xff]   ;;  %v2093_v22 = vld [vmem:[#allocation4 + $0x160] ss:$16 sps:$4 sm:$0xff]  }
  0x4a   :  { %v2098_v21 = vld [vmem:[#allocation4 + $0x364] ss:$16 sps:$4 sm:$0xff]   ;;  %v2096_v23 = vld [vmem:[#allocation4 + $0x360] ss:$16 sps:$4 sm:$0xff]   ;;  %v2380_v39 = vshrl.u32 %v105_v38, 7 }
  0x4b   :  { %v2101_v24 = vld [vmem:[#allocation4 + $0x144] ss:$16 sps:$4 sm:$0xff]   ;;  %v2099_v26 = vld [vmem:[#allocation4 + $0x140] ss:$16 sps:$4 sm:$0xff]   ;;  %v2156_v38 = vld [vmem:[#allocation4 + $0x228] ss:$16 sps:$4 sm:$0xff]  }
  0x4c   :  { %1176 = vmatpush1.bf16.msra.mxu0 %v2027_v42  ;;  %1219 = vmatpush1.bf16.msra.mxu1 %v2030_v43  ;;  %v2104_v25 = vld [vmem:[#allocation4 + $0x344] ss:$16 sps:$4 sm:$0xff]   ;;  %v2102_v27 = vld [vmem:[#allocation4 + $0x340] ss:$16 sps:$4 sm:$0xff]   ;;  %v111_v40 = vsub.s32 1, %v2380_v39  ;;  %v119_v41 = vsub.s32 3, %v2380_v39 }
  0x4d   :  { %1177 = vmatprep.subr.bf16.mxu0 %v2035_v44  ;;  %1220 = vmatprep.subr.bf16.mxu1 %v2038_v45  ;;  %v2107_v28 = vld [vmem:[#allocation4 + $0x124] ss:$16 sps:$4 sm:$0xff]   ;;  %v2105_v30 = vld [vmem:[#allocation4 + $0x120] ss:$16 sps:$4 sm:$0xff]   ;;  %v107_v42 = vsub.s32 0, %v2380_v39  ;;  %v115_v43 = vsub.s32 2, %v2380_v39 }
  0x4e   :  { %v2110_v29 = vld [vmem:[#allocation4 + $0x324] ss:$16 sps:$4 sm:$0xff]   ;;  %v2108_v31 = vld [vmem:[#allocation4 + $0x320] ss:$16 sps:$4 sm:$0xff]  }
  0x4f   :  { %v2113_v32 = vld [vmem:[#allocation4 + $0x104] ss:$16 sps:$4 sm:$0xff]   ;;  %v2111_v34 = vld [vmem:[#allocation4 + $0x100] ss:$16 sps:$4 sm:$0xff]  }
  0x50   :  { %1178 = vmatpush1.bf16.msra.mxu0 %v2033_v46  ;;  %1221 = vmatpush1.bf16.msra.mxu1 %v2036_v47  ;;  %v2116_v33 = vld [vmem:[#allocation4 + $0x304] ss:$16 sps:$4 sm:$0xff]   ;;  %v2114_v35 = vld [vmem:[#allocation4 + $0x300] ss:$16 sps:$4 sm:$0xff]  }
  0x51   :  { %1179 = vmatprep.subr.bf16.mxu0 %v2041_v48  ;;  %1222 = vmatprep.subr.bf16.mxu1 %v2044_v49  ;;  %v103_v44 = vld [vmem:[%s2427_s2] sm:$0xf] }
  0x52   :  { %v112_v47 = vrot.slane %v103_v44, %v111_v40  ;;  %v120_v48 = vrot.slane %v103_v44, %v119_v41  ;;  %v108_v49 = vrot.slane %v103_v44, %v107_v42 }
  0x54   :  { %1180 = vmatpush1.bf16.msra.mxu0 %v2039_v50  ;;  %1223 = vmatpush1.bf16.msra.mxu1 %v2042_v51  ;;  %v116_v50 = vrot.slane %v103_v44, %v115_v43  ;;  %v2161_v44 = vld [vmem:[#allocation4 + $0xc] ss:$16 sps:$4 sm:$0xff]  }
  0x55   :  { %1181 = vmatprep.subr.bf16.mxu0 %v2047_v52  ;;  %1224 = vmatprep.subr.bf16.mxu1 %v2050_v53 }
  0x58   :  { %1182 = vmatpush1.bf16.msra.mxu0 %v2045_v54  ;;  %1225 = vmatpush1.bf16.msra.mxu1 %v2048_v55 }
  0x59   :  { %1183 = vmatprep.subr.bf16.mxu0 %v2053_v56  ;;  %1226 = vmatprep.subr.bf16.mxu1 %v2056_v57 }
  0x5c   :  { %1184 = vmatpush1.bf16.msra.mxu0 %v2051_v58  ;;  %1227 = vmatpush1.bf16.msra.mxu1 %v2054_v59 }
  0x5d   :  { %1185 = vmatprep.subr.bf16.mxu0 %v2059_v60  ;;  %1228 = vmatprep.subr.bf16.mxu1 %v2062_v61 }
  0x60   :  { %1186 = vmatpush1.bf16.msra.mxu0 %v2057_v62  ;;  %1229 = vmatpush1.bf16.msra.mxu1 %v2060_v63 }
  0x61   :  { %1187 = vmatprep.subr.bf16.mxu0 %v2065_v0  ;;  %1230 = vmatprep.subr.bf16.mxu1 %v2068_v1 }
  0x64   :  { %1188 = vmatpush1.bf16.msra.mxu0 %v2063_v2  ;;  %1231 = vmatpush1.bf16.msra.mxu1 %v2066_v3 }
  0x65   :  { %1189 = vmatprep.subr.bf16.mxu0 %v2071_v4  ;;  %1232 = vmatprep.subr.bf16.mxu1 %v2074_v5 }
  0x68   :  { %1190 = vmatpush2.bf16.msra.mxu0 %v2069_v6  ;;  %1233 = vmatpush2.bf16.msra.mxu1 %v2072_v7 }
  0x69   :  { %1191 = vmatprep.subr.bf16.mxu0 %v2077_v8  ;;  %1234 = vmatprep.subr.bf16.mxu1 %v2080_v9 }
  0x6c   :  { %1192 = vmatpush2.bf16.msra.mxu0 %v2075_v10  ;;  %1235 = vmatpush2.bf16.msra.mxu1 %v2078_v11  ;;  %v2117_v11 = vld [vmem:[#allocation4 + $0xe8] ss:$16 sps:$4 sm:$0xff]  }
  0x6d   :  { %1193 = vmatprep.subr.bf16.mxu0 %v2083_v12  ;;  %1236 = vmatprep.subr.bf16.mxu1 %v2086_v13  ;;  %v2120_v12 = vld [vmem:[#allocation4 + $0x2e8] ss:$16 sps:$4 sm:$0xff]  }
  0x70   :  { %1194 = vmatpush2.bf16.msra.mxu0 %v2081_v14  ;;  %1237 = vmatpush2.bf16.msra.mxu1 %v2084_v15  ;;  %v2125_v15 = vld [vmem:[#allocation4 + $0xcc] ss:$16 sps:$4 sm:$0xff]  }
  0x71   :  { %1195 = vmatprep.subr.bf16.mxu0 %v2089_v16  ;;  %1238 = vmatprep.subr.bf16.mxu1 %v2092_v17  ;;  %v2128_v16 = vld [vmem:[#allocation4 + $0x2cc] ss:$16 sps:$4 sm:$0xff]   ;;  %v2123_v17 = vld [vmem:[#allocation4 + $0xc8] ss:$16 sps:$4 sm:$0xff]  }
  0x74   :  { %1196 = vmatpush2.bf16.msra.mxu0 %v2087_v18  ;;  %1239 = vmatpush2.bf16.msra.mxu1 %v2090_v19  ;;  %v2126_v18 = vld [vmem:[#allocation4 + $0x2c8] ss:$16 sps:$4 sm:$0xff]   ;;  %v2131_v19 = vld [vmem:[#allocation4 + $0xac] ss:$16 sps:$4 sm:$0xff]  }
  0x75   :  { %1197 = vmatprep.subr.bf16.mxu0 %v2095_v20  ;;  %1240 = vmatprep.subr.bf16.mxu1 %v2098_v21  ;;  %v2134_v20 = vld [vmem:[#allocation4 + $0x2ac] ss:$16 sps:$4 sm:$0xff]   ;;  %v2129_v21 = vld [vmem:[#allocation4 + $0xa8] ss:$16 sps:$4 sm:$0xff]  }
  0x78   :  { %1198 = vmatpush2.bf16.msra.mxu0 %v2093_v22  ;;  %1241 = vmatpush2.bf16.msra.mxu1 %v2096_v23  ;;  %v2132_v22 = vld [vmem:[#allocation4 + $0x2a8] ss:$16 sps:$4 sm:$0xff]   ;;  %v2137_v23 = vld [vmem:[#allocation4 + $0x8c] ss:$16 sps:$4 sm:$0xff]  }
  0x79   :  { %1199 = vmatprep.subr.bf16.mxu0 %v2101_v24  ;;  %1242 = vmatprep.subr.bf16.mxu1 %v2104_v25  ;;  %v2140_v24 = vld [vmem:[#allocation4 + $0x28c] ss:$16 sps:$4 sm:$0xff]   ;;  %v2135_v25 = vld [vmem:[#allocation4 + $0x88] ss:$16 sps:$4 sm:$0xff]  }
  0x7c   :  { %1200 = vmatpush2.bf16.msra.mxu0 %v2099_v26  ;;  %1243 = vmatpush2.bf16.msra.mxu1 %v2102_v27  ;;  %v2138_v26 = vld [vmem:[#allocation4 + $0x288] ss:$16 sps:$4 sm:$0xff]   ;;  %v2143_v27 = vld [vmem:[#allocation4 + $0x6c] ss:$16 sps:$4 sm:$0xff]  }
  0x7d   :  { %1201 = vmatprep.subr.bf16.mxu0 %v2107_v28  ;;  %1244 = vmatprep.subr.bf16.mxu1 %v2110_v29  ;;  %v2146_v28 = vld [vmem:[#allocation4 + $0x26c] ss:$16 sps:$4 sm:$0xff]   ;;  %v2141_v29 = vld [vmem:[#allocation4 + $0x68] ss:$16 sps:$4 sm:$0xff]  }
  0x80   :  { %1202 = vmatpush2.bf16.msra.mxu0 %v2105_v30  ;;  %1245 = vmatpush2.bf16.msra.mxu1 %v2108_v31  ;;  %v2144_v30 = vld [vmem:[#allocation4 + $0x268] ss:$16 sps:$4 sm:$0xff]   ;;  %v2149_v31 = vld [vmem:[#allocation4 + $0x4c] ss:$16 sps:$4 sm:$0xff]  }
  0x81   :  { %1203 = vmatprep.subr.bf16.mxu0 %v2113_v32  ;;  %1246 = vmatprep.subr.bf16.mxu1 %v2116_v33  ;;  %v2152_v32 = vld [vmem:[#allocation4 + $0x24c] ss:$16 sps:$4 sm:$0xff]   ;;  %v2147_v33 = vld [vmem:[#allocation4 + $0x48] ss:$16 sps:$4 sm:$0xff]  }
  0x84   :  { %1204 = vmatpush2.bf16.msra.mxu0 %v2111_v34  ;;  %1247 = vmatpush2.bf16.msra.mxu1 %v2114_v35  ;;  %v2150_v34 = vld [vmem:[#allocation4 + $0x248] ss:$16 sps:$4 sm:$0xff]   ;;  %v2155_v35 = vld [vmem:[#allocation4 + $0x2c] ss:$16 sps:$4 sm:$0xff]  }
  0x85   :  { %1259 = vmatprep.subr.bf16.mxu0 %v2119_v36  ;;  %1302 = vmatprep.subr.bf16.mxu1 %v2122_v37  ;;  %v2158_v36 = vld [vmem:[#allocation4 + $0x22c] ss:$16 sps:$4 sm:$0xff]   ;;  %v2153_v37 = vld [vmem:[#allocation4 + $0x28] ss:$16 sps:$4 sm:$0xff]  }
 0x107   :  { %v319_v45 = vpop.f32.mrf.mxu0  ;;  %v362_v46 = vpop.f32.mrf.mxu1 }
 0x108   :  { %v320_v59 = vadd.f32 %v319_v45, %v108_v49  ;;  %v363_v60 = vadd.f32 %v362_v46, %v116_v50  ;;  %v2164_v45 = vld [vmem:[#allocation4 + $0x20c] ss:$16 sps:$4 sm:$0xff]   ;;  %v2159_v46 = vld [vmem:[#allocation4 + $0x8] ss:$16 sps:$4 sm:$0xff]  }
 0x109   :  { %v321_v51 = vpop.f32.mrf.mxu0  ;;  %v364_v52 = vpop.f32.mrf.mxu1 }
 0x10a   :  { %v322_v55 = vadd.f32 %v321_v51, %v112_v47  ;;  %v365_v56 = vadd.f32 %v364_v52, %v120_v48  ;;  %v371_v7 = vmax.f32 %v320_v59, 0.0  ;;  %v373_v8 = vmax.f32 %v363_v60, 0.0  ;;  %v2168_v51 = vld [vmem:[#allocation4 + $0x3e8] ss:$16 sps:$4 sm:$0xff]   ;;  %v2173_v52 = vld [vmem:[#allocation4 + $0x1cc] ss:$16 sps:$4 sm:$0xff]  }
 0x10b   :  { %v323_v53 = vpop.f32.mrf.mxu0  ;;  %v366_v54 = vpop.f32.mrf.mxu1  ;;  %v2180_v59 = vld [vmem:[#allocation4 + $0x3a8] ss:$16 sps:$4 sm:$0xff]   ;;  %v2185_v60 = vld [vmem:[#allocation4 + $0x18c] ss:$16 sps:$4 sm:$0xff]  }
 0x10c   :  { %v324_v57 = vadd.f32 %v323_v53, %v108_v49  ;;  %v367_v58 = vadd.f32 %v366_v54, %v116_v50  ;;  %v372_v3 = vmax.f32 %v322_v55, 0.0  ;;  %v374_v4 = vmax.f32 %v365_v56, 0.0  ;;  %v2170_v49 = vld [vmem:[#allocation4 + $0x3ec] ss:$16 sps:$4 sm:$0xff]   ;;  %v2165_v50 = vld [vmem:[#allocation4 + $0x1e8] ss:$16 sps:$4 sm:$0xff]  }
 0x10d   :  { %v325_v61 = vpop.f32.mrf.mxu0  ;;  %v368_v62 = vpop.f32.mrf.mxu1  ;;  %v2176_v53 = vld [vmem:[#allocation4 + $0x3cc] ss:$16 sps:$4 sm:$0xff]   ;;  %v2171_v54 = vld [vmem:[#allocation4 + $0x1c8] ss:$16 sps:$4 sm:$0xff]  }
 0x10e   :  { %v326_v63 = vadd.f32 %v325_v61, %v112_v47  ;;  %v369_v0 = vadd.f32 %v368_v62, %v120_v48  ;;  %v375_v1 = vmax.f32 %v324_v57, 0.0  ;;  %v377_v2 = vmax.f32 %v367_v58, 0.0  ;;  %v2162_v47 = vld [vmem:[#allocation4 + $0x208] ss:$16 sps:$4 sm:$0xff]   ;;  %v2167_v48 = vld [vmem:[#allocation4 + $0x1ec] ss:$16 sps:$4 sm:$0xff]  }
 0x10f   :  { %v2174_v55 = vld [vmem:[#allocation4 + $0x3c8] ss:$16 sps:$4 sm:$0xff]   ;;  %v2179_v56 = vld [vmem:[#allocation4 + $0x1ac] ss:$16 sps:$4 sm:$0xff]  }
 0x110   :  { %v376_v5 = vmax.f32 %v326_v63, 0.0  ;;  %v378_v6 = vmax.f32 %v369_v0, 0.0  ;;  %v2397_v13 = vpack.c.bf16 %v375_v1, %v371_v7  ;;  %v2399_v14 = vpack.c.bf16 %v377_v2, %v373_v8  ;;  %v2182_v57 = vld [vmem:[#allocation4 + $0x3ac] ss:$16 sps:$4 sm:$0xff]   ;;  %v2177_v58 = vld [vmem:[#allocation4 + $0x1a8] ss:$16 sps:$4 sm:$0xff]  }
 0x111   :  { %v2188_v61 = vld [vmem:[#allocation4 + $0x38c] ss:$16 sps:$4 sm:$0xff]   ;;  %v2183_v62 = vld [vmem:[#allocation4 + $0x188] ss:$16 sps:$4 sm:$0xff]  }
 0x112   :  { %v380_v9 = vpack.c.bf16 %v376_v5, %v372_v3  ;;  %v382_v10 = vpack.c.bf16 %v378_v6, %v374_v4  ;;  %v2186_v63 = vld [vmem:[#allocation4 + $0x388] ss:$16 sps:$4 sm:$0xff]   ;;  %v2191_v0 = vld [vmem:[#allocation4 + $0x16c] ss:$16 sps:$4 sm:$0xff]  }
 0x113   :  { %v2194_v1 = vld [vmem:[#allocation4 + $0x36c] ss:$16 sps:$4 sm:$0xff]   ;;  %v2189_v2 = vld [vmem:[#allocation4 + $0x168] ss:$16 sps:$4 sm:$0xff]  }
 0x114   :  { %1205 = vmatprep.mubr.bf16.mxu0 %v380_v9  ;;  %1248 = vmatprep.mubr.bf16.mxu1 %v382_v10  ;;  %v2192_v3 = vld [vmem:[#allocation4 + $0x368] ss:$16 sps:$4 sm:$0xff]   ;;  %v2197_v4 = vld [vmem:[#allocation4 + $0x14c] ss:$16 sps:$4 sm:$0xff]  }
 0x115   :  { %1206 = vmatmul.mubr.bf16.vlgmr.msra.gmra.mxu0 %v2397_v13  ;;  %1249 = vmatmul.mubr.bf16.vlgmr.msra.gmra.mxu1 %v2399_v14  ;;  %v2200_v5 = vld [vmem:[#allocation4 + $0x34c] ss:$16 sps:$4 sm:$0xff]   ;;  %v2195_v6 = vld [vmem:[#allocation4 + $0x148] ss:$16 sps:$4 sm:$0xff]  }
 0x116   :  { %1260 = vmatpush1.bf16.msra.mxu0 %v2117_v11  ;;  %1303 = vmatpush1.bf16.msra.mxu1 %v2120_v12  ;;  %v2198_v7 = vld [vmem:[#allocation4 + $0x348] ss:$16 sps:$4 sm:$0xff]   ;;  %v2203_v8 = vld [vmem:[#allocation4 + $0x12c] ss:$16 sps:$4 sm:$0xff]  }
 0x117   :  { %1291 = vmatprep.mubr.bf16.mxu0 %v380_v9  ;;  %1334 = vmatprep.mubr.bf16.mxu1 %v382_v10  ;;  %v2206_v9 = vld [vmem:[#allocation4 + $0x32c] ss:$16 sps:$4 sm:$0xff]   ;;  %v2201_v10 = vld [vmem:[#allocation4 + $0x128] ss:$16 sps:$4 sm:$0xff]  }
 0x118   :  { %1261 = vmatprep.subr.bf16.mxu0 %v2125_v15  ;;  %1304 = vmatprep.subr.bf16.mxu1 %v2128_v16  ;;  %v2204_v11 = vld [vmem:[#allocation4 + $0x328] ss:$16 sps:$4 sm:$0xff]   ;;  %v2209_v12 = vld [vmem:[#allocation4 + $0x10c] ss:$16 sps:$4 sm:$0xff]  }
 0x119   :  { %v2212_v15 = vld [vmem:[#allocation4 + $0x30c] ss:$16 sps:$4 sm:$0xff]   ;;  %v2207_v16 = vld [vmem:[#allocation4 + $0x108] ss:$16 sps:$4 sm:$0xff]  }
 0x11a   :  { %1262 = vmatpush1.bf16.msra.mxu0 %v2123_v17  ;;  %1305 = vmatpush1.bf16.msra.mxu1 %v2126_v18  ;;  %v2210_v17 = vld [vmem:[#allocation4 + $0x308] ss:$16 sps:$4 sm:$0xff]  }
 0x11b   :  { %1263 = vmatprep.subr.bf16.mxu0 %v2131_v19  ;;  %1306 = vmatprep.subr.bf16.mxu1 %v2134_v20  ;;  %v2213_v18 = vld [vmem:[#allocation6 + $0x78] sm:$0xff]   ;;  %v2215_v20 = vld [vmem:[#allocation6 + $0x70] sm:$0xff]  }
 0x11c   :  { %v2214_v19 = vld [vmem:[#allocation6 + $0x38] sm:$0xff]  }
 0x11e   :  { %1264 = vmatpush1.bf16.msra.mxu0 %v2129_v21  ;;  %1307 = vmatpush1.bf16.msra.mxu1 %v2132_v22  ;;  %v2216_v21 = vld [vmem:[#allocation6 + $0x30] sm:$0xff]   ;;  %v2217_v22 = vld [vmem:[#allocation6 + $0x68] sm:$0xff]  }
 0x11f   :  { %1265 = vmatprep.subr.bf16.mxu0 %v2137_v23  ;;  %1308 = vmatprep.subr.bf16.mxu1 %v2140_v24  ;;  %v2218_v23 = vld [vmem:[#allocation6 + $0x28] sm:$0xff]   ;;  %v2219_v24 = vld [vmem:[#allocation6 + $0x60] sm:$0xff]  }
 0x122   :  { %1266 = vmatpush1.bf16.msra.mxu0 %v2135_v25  ;;  %1309 = vmatpush1.bf16.msra.mxu1 %v2138_v26  ;;  %v2220_v25 = vld [vmem:[#allocation6 + $0x20] sm:$0xff]   ;;  %v2221_v26 = vld [vmem:[#allocation6 + $0x58] sm:$0xff]  }
 0x123   :  { %1267 = vmatprep.subr.bf16.mxu0 %v2143_v27  ;;  %1310 = vmatprep.subr.bf16.mxu1 %v2146_v28  ;;  %v2222_v27 = vld [vmem:[#allocation6 + $0x18] sm:$0xff]   ;;  %v2223_v28 = vld [vmem:[#allocation6 + $0x50] sm:$0xff]  }
 0x126   :  { %1268 = vmatpush1.bf16.msra.mxu0 %v2141_v29  ;;  %1311 = vmatpush1.bf16.msra.mxu1 %v2144_v30  ;;  %v2229_v29 = vld [vmem:[#allocation6 + $0xf8] sm:$0xff]   ;;  %v2231_v30 = vld [vmem:[#allocation6 + $0xf0] sm:$0xff]  }
 0x127   :  { %1269 = vmatprep.subr.bf16.mxu0 %v2149_v31  ;;  %1312 = vmatprep.subr.bf16.mxu1 %v2152_v32  ;;  %v2225_v31 = vld [vmem:[#allocation6 + $0x48] sm:$0xff]   ;;  %v2232_v32 = vld [vmem:[#allocation6 + $0xb0] sm:$0xff]  }
 0x12a   :  { %1270 = vmatpush1.bf16.msra.mxu0 %v2147_v33  ;;  %1313 = vmatpush1.bf16.msra.mxu1 %v2150_v34  ;;  %v2233_v33 = vld [vmem:[#allocation6 + $0xe8] sm:$0xff]  }
 0x12b   :  { %1271 = vmatprep.subr.bf16.mxu0 %v2155_v35  ;;  %1314 = vmatprep.subr.bf16.mxu1 %v2158_v36  ;;  %v2226_v34 = vld [vmem:[#allocation6 + $0x8] sm:$0xff]   ;;  %v2227_v35 = vld [vmem:[#allocation6 + $0x40] sm:$0xff]  }
 0x12c   :  { %v2234_v36 = vld [vmem:[#allocation6 + $0xa8] sm:$0xff]  }
 0x12e   :  { %1272 = vmatpush1.bf16.msra.mxu0 %v2153_v37  ;;  %1315 = vmatpush1.bf16.msra.mxu1 %v2156_v38  ;;  %v2235_v37 = vld [vmem:[#allocation6 + $0xe0] sm:$0xff]  }
 0x12f   :  { %1273 = vmatprep.subr.bf16.mxu0 %v2161_v44  ;;  %1316 = vmatprep.subr.bf16.mxu1 %v2164_v45  ;;  %v2228_v38 = vld [vmem:[#allocation6] sm:$0xff]   ;;  %v2237_v45 = vld [vmem:[#allocation6 + $0xd8] sm:$0xff]  }
 0x130   :  { %v2236_v44 = vld [vmem:[#allocation6 + $0xa0] sm:$0xff]  }
 0x132   :  { %1274 = vmatpush1.bf16.msra.mxu0 %v2159_v46  ;;  %1317 = vmatpush1.bf16.msra.mxu1 %v2162_v47  ;;  %v2238_v46 = vld [vmem:[#allocation6 + $0x98] sm:$0xff]   ;;  %v2239_v47 = vld [vmem:[#allocation6 + $0xd0] sm:$0xff]  }
 0x133   :  { %1275 = vmatprep.subr.bf16.mxu0 %v2167_v48  ;;  %1318 = vmatprep.subr.bf16.mxu1 %v2170_v49  ;;  %v2240_v48 = vld [vmem:[#allocation6 + $0x90] sm:$0xff]   ;;  %v2241_v49 = vld [vmem:[#allocation6 + $0xc8] sm:$0xff]  }
 0x136   :  { %1276 = vmatpush2.bf16.msra.mxu0 %v2165_v50  ;;  %1319 = vmatpush2.bf16.msra.mxu1 %v2168_v51  ;;  %v2242_v50 = vld [vmem:[#allocation6 + $0x88] sm:$0xff]   ;;  %v2243_v51 = vld [vmem:[#allocation6 + $0xc0] sm:$0xff]  }
 0x137   :  { %1277 = vmatprep.subr.bf16.mxu0 %v2173_v52  ;;  %1320 = vmatprep.subr.bf16.mxu1 %v2176_v53  ;;  %v2244_v52 = vld [vmem:[#allocation6 + $0x80] sm:$0xff]  }
 0x138   :  { %v511_v53 = vld [vmem:[%s2429_s4] sm:$0xf] }
 0x13a   :  { %1278 = vmatpush2.bf16.msra.mxu0 %v2171_v54  ;;  %1321 = vmatpush2.bf16.msra.mxu1 %v2174_v55  ;;  %v520_v54 = vrot.slane %v511_v53, %v111_v40  ;;  %v516_v55 = vrot.slane %v511_v53, %v107_v42 }
 0x13b   :  { %1279 = vmatprep.subr.bf16.mxu0 %v2179_v56  ;;  %1322 = vmatprep.subr.bf16.mxu1 %v2182_v57 }
 0x13e   :  { %1280 = vmatpush2.bf16.msra.mxu0 %v2177_v58  ;;  %1323 = vmatpush2.bf16.msra.mxu1 %v2180_v59 }
 0x13f   :  { %1281 = vmatprep.subr.bf16.mxu0 %v2185_v60  ;;  %1324 = vmatprep.subr.bf16.mxu1 %v2188_v61 }
 0x142   :  { %1282 = vmatpush2.bf16.msra.mxu0 %v2183_v62  ;;  %1325 = vmatpush2.bf16.msra.mxu1 %v2186_v63 }
 0x143   :  { %1283 = vmatprep.subr.bf16.mxu0 %v2191_v0  ;;  %1326 = vmatprep.subr.bf16.mxu1 %v2194_v1 }
 0x146   :  { %1284 = vmatpush2.bf16.msra.mxu0 %v2189_v2  ;;  %1327 = vmatpush2.bf16.msra.mxu1 %v2192_v3 }
 0x147   :  { %1285 = vmatprep.subr.bf16.mxu0 %v2197_v4  ;;  %1328 = vmatprep.subr.bf16.mxu1 %v2200_v5 }
 0x14a   :  { %1286 = vmatpush2.bf16.msra.mxu0 %v2195_v6  ;;  %1329 = vmatpush2.bf16.msra.mxu1 %v2198_v7 }
 0x14b   :  { %1287 = vmatprep.subr.bf16.mxu0 %v2203_v8  ;;  %1330 = vmatprep.subr.bf16.mxu1 %v2206_v9 }
 0x14e   :  { %1288 = vmatpush2.bf16.msra.mxu0 %v2201_v10  ;;  %1331 = vmatpush2.bf16.msra.mxu1 %v2204_v11 }
 0x14f   :  { %1289 = vmatprep.subr.bf16.mxu0 %v2209_v12  ;;  %1332 = vmatprep.subr.bf16.mxu1 %v2212_v15  ;;  %v528_v12 = vrot.slane %v511_v53, %v119_v41  ;;  %v524_v15 = vrot.slane %v511_v53, %v115_v43 }
 0x152   :  { %1290 = vmatpush2.bf16.msra.mxu0 %v2207_v16  ;;  %1333 = vmatpush2.bf16.msra.mxu1 %v2210_v17 }
 0x153   :  { %1921 = vmatprep.subr.bf16.mxu0 %v2213_v18  ;;  %1943 = vmatprep.subr.bf16.mxu1 %v2229_v29 }
 0x155   :  { %1292 = vmatmul.mubr.bf16.vlgmr.msra.gmra.mxu0 %v2397_v13  ;;  %1335 = vmatmul.mubr.bf16.vlgmr.msra.gmra.mxu1 %v2399_v14  ;;  %v2230_v13 = vld [vmem:[#allocation6 + $0xb8] sm:$0xff]   ;;  %v2224_v14 = vld [vmem:[#allocation6 + $0x10] sm:$0xff]  }
 0x156   :  { %1922 = vmatpush3.bf16.msra.mxu0 %v2214_v19  ;;  %1944 = vmatpush3.bf16.msra.mxu1 %v2230_v13 }
 0x157   :  { %1923 = vmatprep.subr.bf16.mxu0 %v2215_v20  ;;  %1945 = vmatprep.subr.bf16.mxu1 %v2231_v30 }
 0x15a   :  { %1924 = vmatpush3.bf16.msra.mxu0 %v2216_v21  ;;  %1946 = vmatpush3.bf16.msra.mxu1 %v2232_v32 }
 0x15b   :  { %1925 = vmatprep.subr.bf16.mxu0 %v2217_v22  ;;  %1947 = vmatprep.subr.bf16.mxu1 %v2233_v33 }
 0x15e   :  { %1926 = vmatpush3.bf16.msra.mxu0 %v2218_v23  ;;  %1948 = vmatpush3.bf16.msra.mxu1 %v2234_v36 }
 0x15f   :  { %1927 = vmatprep.subr.bf16.mxu0 %v2219_v24  ;;  %1949 = vmatprep.subr.bf16.mxu1 %v2235_v37  ;;  %v1888_v37 = vld [vmem:[%s2431_s6] ss:$0 sm:$0xff] }
 0x162   :  { %1928 = vmatpush3.bf16.msra.mxu0 %v2220_v25  ;;  %1950 = vmatpush3.bf16.msra.mxu1 %v2236_v44 }
 0x163   :  { %1929 = vmatprep.subr.bf16.mxu0 %v2221_v26  ;;  %1951 = vmatprep.subr.bf16.mxu1 %v2237_v45 }
 0x166   :  { %1930 = vmatpush3.bf16.msra.mxu0 %v2222_v27  ;;  %1952 = vmatpush3.bf16.msra.mxu1 %v2238_v46 }
 0x167   :  { %1931 = vmatprep.subr.bf16.mxu0 %v2223_v28  ;;  %1953 = vmatprep.subr.bf16.mxu1 %v2239_v47 }
 0x16a   :  { %1932 = vmatpush3.bf16.msra.mxu0 %v2224_v14  ;;  %1954 = vmatpush3.bf16.msra.mxu1 %v2240_v48 }
 0x16b   :  { %1933 = vmatprep.subr.bf16.mxu0 %v2225_v31  ;;  %1955 = vmatprep.subr.bf16.mxu1 %v2241_v49 }
 0x16e   :  { %1934 = vmatpush3.bf16.msra.mxu0 %v2226_v34  ;;  %1956 = vmatpush3.bf16.msra.mxu1 %v2242_v50 }
 0x16f   :  { %1935 = vmatprep.subr.bf16.mxu0 %v2227_v35  ;;  %1957 = vmatprep.subr.bf16.mxu1 %v2243_v51 }
 0x172   :  { %1936 = vmatpush3.bf16.msra.mxu0 %v2228_v38  ;;  %1958 = vmatpush3.bf16.msra.mxu1 %v2244_v52 }
 0x1d5   :  { %v1207_v56 = vpop.f32.mrf.mxu0  ;;  %v1250_v57 = vpop.f32.mrf.mxu1 }
 0x1d6   :  { %v1208_v61 = vadd.f32 %v1207_v56, %v516_v55 }
 0x1d7   :  { %v1209_v58 = vpop.f32.mrf.mxu0  ;;  %v1252_v59 = vpop.f32.mrf.mxu1 }
 0x1d8   :  { %v1210_v60 = vadd.f32 %v1209_v58, %v520_v54  ;;  %v1251_v5 = vadd.f32 %v1250_v57, %v1208_v61 }
 0x1d9   :  { %v1211_v62 = vpop.f32.mrf.mxu0  ;;  %v1254_v63 = vpop.f32.mrf.mxu1 }
 0x1da   :  { %v1212_v0 = vadd.f32 %v1211_v62, %v516_v55  ;;  %v1253_v2 = vadd.f32 %v1252_v59, %v1210_v60  ;;  %v1345_v42 = vmax.f32 %v1251_v5, 0.0 }
 0x1db   :  { %v1213_v1 = vpop.f32.mrf.mxu0  ;;  %v1256_v6 = vpop.f32.mrf.mxu1 }
 0x1dc   :  { %v1255_v3 = vadd.f32 %v1254_v63, %v1212_v0  ;;  %v1214_v4 = vadd.f32 %v1213_v1, %v520_v54  ;;  %v1346_v8 = vmax.f32 %v1253_v2, 0.0 }
 0x1de   :  { %v1257_v7 = vadd.f32 %v1256_v6, %v1214_v4  ;;  %v1349_v40 = vmax.f32 %v1255_v3, 0.0 }
 0x1e0   :  { %v1350_v9 = vmax.f32 %v1257_v7, 0.0  ;;  %v1353_v11 = vpack.c.bf16 %v1349_v40, %v1345_v42 }
 0x1e2   :  { %v1354_v10 = vpack.c.bf16 %v1350_v9, %v1346_v8 }
 0x1e4   :  { %1652 = vmatprep.mubr.bf16.mxu0 %v1354_v10 }
 0x1e5   :  { %1653 = vmatmul.mubr.bf16.vlgmr.msra.gmra.mxu0 %v1353_v11 }
 0x215   :  { %v1293_v16 = vpop.f32.mrf.mxu0  ;;  %v1336_v17 = vpop.f32.mrf.mxu1 }
 0x216   :  { %v1294_v21 = vadd.f32 %v1293_v16, %v524_v15 }
 0x217   :  { %v1295_v18 = vpop.f32.mrf.mxu0  ;;  %v1338_v19 = vpop.f32.mrf.mxu1 }
 0x218   :  { %v1296_v20 = vadd.f32 %v1295_v18, %v528_v12  ;;  %v1337_v29 = vadd.f32 %v1336_v17, %v1294_v21 }
 0x219   :  { %v1297_v22 = vpop.f32.mrf.mxu0  ;;  %v1340_v23 = vpop.f32.mrf.mxu1 }
 0x21a   :  { %v1298_v24 = vadd.f32 %v1297_v22, %v524_v15  ;;  %v1339_v26 = vadd.f32 %v1338_v19, %v1296_v20  ;;  %v1347_v43 = vmax.f32 %v1337_v29, 0.0 }
 0x21b   :  { %v1299_v25 = vpop.f32.mrf.mxu0  ;;  %v1342_v13 = vpop.f32.mrf.mxu1 }
 0x21c   :  { %v1341_v27 = vadd.f32 %v1340_v23, %v1298_v24  ;;  %v1300_v28 = vadd.f32 %v1299_v25, %v528_v12  ;;  %v1348_v14 = vmax.f32 %v1339_v26, 0.0 }
 0x21e   :  { %v1343_v30 = vadd.f32 %v1342_v13, %v1300_v28  ;;  %v1351_v41 = vmax.f32 %v1341_v27, 0.0 }
 0x220   :  { %v1352_v39 = vmax.f32 %v1343_v30, 0.0  ;;  %v1355_v32 = vpack.c.bf16 %v1351_v41, %v1347_v43 }
 0x222   :  { %v1356_v31 = vpack.c.bf16 %v1352_v39, %v1348_v14 }
 0x224   :  { %1693 = vmatprep.mubr.bf16.mxu1 %v1356_v31 }
 0x225   :  { %1694 = vmatmul.mubr.bf16.vlgmr.msra.gmra.mxu1 %v1355_v32 }
 0x2a5   :  { %v1937_v33 = vpop.f32.mrf.mxu0 }
 0x2a7   :  { %v1938_v34 = vpop.f32.mrf.mxu0 }
 0x2a8   :  { %v1939_v36 = vadd.f32 %v1938_v34, %v1937_v33 }
 0x2a9   :  { %v1940_v35 = vpop.f32.mrf.mxu0 }
 0x2aa   :  { %v1655_v46 = vadd.f32 %v1939_v36, %v1888_v37 }
 0x2ab   :  { %v1941_v38 = vpop.f32.mrf.mxu0 }
 0x2ac   :  { %v1942_v47 = vadd.f32 %v1941_v38, %v1940_v35 }
 0x2ae   :  { %v1658_v52 = vadd.f32 %v1942_v47, %v1888_v37 }
 0x2e5   :  { %v1959_v44 = vpop.f32.mrf.mxu1 }
 0x2e7   :  { %v1960_v45 = vpop.f32.mrf.mxu1 }
 0x2e8   :  { %v1961_v48 = vadd.f32 %v1960_v45, %v1959_v44 }
 0x2e9   :  { %v1962_v49 = vpop.f32.mrf.mxu1 }
 0x2ea   :  { %v1696_v50 = vadd.f32 %v1961_v48, %v1655_v46 }
 0x2eb   :  { %v1963_v51 = vpop.f32.mrf.mxu1 }
 0x2ec   :  { %v1964_v53 = vadd.f32 %v1963_v51, %v1962_v49  ;;  %1702 = vmax.xlane.f32.xlu0 %v1696_v50 }
 0x2ee   :  { %v1699_v54 = vadd.f32 %v1964_v53, %v1658_v52 }
 0x2f0   :  { %1704 = vmax.xlane.f32.xlu0 %v1699_v54 }
 0x375   :  { %v1703_v55 = vpop.xlane.xlu0 %1702 }
 0x376   :  { %v1706_v56 = vsub.f32 %v1696_v50, %v1703_v55 }
 0x378   :  { %v1708_v57 = vmul.f32 1.442695, %v1706_v56 }
 0x379   :  { %v1705_v58 = vpop.xlane.xlu0 %1704 }
 0x37a   :  { %2245 = vpow2.f32 %v1708_v57  ;;  %v1707_v59 = vsub.f32 %v1699_v54, %v1705_v58 }
 0x37c   :  { %v1710_v60 = vmul.f32 1.442695, %v1707_v59 }
 0x37e   :  { %2247 = vpow2.f32 %v1710_v60 }
 0x387   :  { %v2246_v61 = vpop.eup %2245 }
 0x388   :  { %1712 = vadd.xlane.f32.xlu1 %v2246_v61 }
 0x38b   :  { %v2248_v62 = vpop.eup %2247 }
 0x38c   :  { %1714 = vadd.xlane.f32.xlu1 %v2248_v62 }
 0x411   :  { %v1713_v63 = vpop.xlane.xlu1 %1712 }
 0x412   :  { %2249 = vrcp.f32 %v1713_v63 }
 0x415   :  { %v1715_v0 = vpop.xlane.xlu1 %1714 }
 0x416   :  { %2251 = vrcp.f32 %v1715_v0 }
 0x41f   :  { %v2250_v1 = vpop.eup %2249 }
 0x420   :  { %v1717_v2 = vmul.f32 %v2250_v1, %v2246_v61 }
 0x422   :  { %1720 = vst [vmem:[%s2432_s7] sm:$0xff] %v1717_v2 }
 0x423   :  { %v2252_v3 = vpop.eup %2251 }
 0x424   :  { %v1719_v4 = vmul.f32 %v2252_v3, %v2248_v62 }
 0x426   :  { %1721 = vst [vmem:[%s2432_s7 + $0x8] sm:$0xff] %v1719_v4 }
 0x427   :  { %1726 = vsyncpa [#allocation3], 1 }
 0x428   :  { %1727 = vsyncpa [#allocation5], 1 }

</bundles_post_ra>
